<compile_context>
chip_gen: v7x
topology: tpu7x:2x2x1
jax: 0.10.0
libtpu: 0.0.40
codegen_flags: <defaults>
</compile_context>

<pallas_src>
import jax
import jax.numpy as jnp
from jax.experimental import pallas as pl
from jax.experimental.pallas import tpu as pltpu

_LANE = 128
_SUBLANE = 8
# ~2 MiB per block => 8 MiB VMEM with double-buffered input + output.
_TARGET_BLOCK_BYTES = 2 * 1024 * 1024


def _residual_block_kernel(x_ref, o_ref):
    # ResidualBlock with Identity blocks/shortcut: out = relu(x + x).
    x = x_ref[...]
    y = x + x
    o_ref[...] = jnp.maximum(y, jnp.zeros_like(y))


def _pick_last_dim(n_elem, max_last=1024):
    """Largest multiple-of-128 divisor of n_elem, capped at max_last (0 if none)."""
    best = 0
    last = _LANE
    while last <= max_last:
        if n_elem % last == 0:
            best = last
        last += _LANE
    return best


def residual_block_forward(x, in_channels, out_channels, activation="relu"):
    """JAX/Pallas equivalent of ResidualBlock.forward for the default module.

    blocks/shortcut are nn.Identity(); activation defaults to ReLU, so the
    forward reduces to out = relu(x + x). in_channels/out_channels only gate
    the (Identity) shortcut in the reference, so they don't change the math.
    """
    assert activation == "relu", "only relu implemented (module default)"
    # TODO(synk): leaky_relu / selu / none variants not wired (module defaults to relu).
    # NOTE: for small activations the plain XLA fusion jnp.maximum(x + x, 0) is
    # competitive; benchmark before preferring this Pallas path at tiny sizes.

    orig_shape = x.shape
    orig_dtype = x.dtype
    n_elem = x.size
    itemsize = jnp.dtype(orig_dtype).itemsize

    # ---- layout: lane-dense (rows, LAST) slab, avoiding padding when possible.
    last = _pick_last_dim(n_elem)
    pad = 0
    if last == 0:
        # No multiple-of-128 divisor: fall back to a padded 512-wide slab
        # (costs one extra HBM pass each for pad and tail-slice).
        last = 512
        rows = pl.cdiv(n_elem, last)
        pad = rows * last - n_elem
    else:
        rows = n_elem // last

    x_flat = x.reshape(-1)
    if pad:
        x_flat = jnp.pad(x_flat, (0, pad))
    x2d = x_flat.reshape(rows, last)

    # ---- dtype-aware tile: keep each block ~2 MiB regardless of element width
    # (f32: 1024x512 equiv, bf16: 2048x512 equiv, int8/fp8: 4096x512 equiv).
    max_block_rows = max(_SUBLANE, _TARGET_BLOCK_BYTES // (last * itemsize))
    max_block_rows = (max_block_rows // _SUBLANE) * _SUBLANE
    if rows <= max_block_rows:
        block_rows = rows            # full dim -> always a legal block shape
    else:
        block_rows = max_block_rows  # multiple of 8; Pallas masks a ragged last block
    grid = (pl.cdiv(rows, block_rows),)

    cost = pl.CostEstimate(
        flops=2 * n_elem,                         # one add + one max per element
        transcendentals=0,
        bytes_accessed=2 * n_elem * itemsize,     # one read + one write stream
    )

    out2d = pl.pallas_call(
        _residual_block_kernel,
        out_shape=jax.ShapeDtypeStruct((rows, last), orig_dtype),
        grid_spec=pl.GridSpec(
            grid=grid,
            in_specs=[pl.BlockSpec((block_rows, last), lambda i: (i, 0))],
            out_specs=pl.BlockSpec((block_rows, last), lambda i: (i, 0)),
        ),
        # Input and output slabs have identical shape/dtype: reuse the HBM buffer.
        input_output_aliases={0: 0},
        cost_estimate=cost,
        compiler_params=pltpu.CompilerParams(
            # Independent elementwise tiles: allows v7x to shard across both TCs.
            # TODO(synk): verify in an xprof trace that "parallel" really shards
            # across both v7x TensorCores; otherwise switch to pltpu.CORE_PARALLEL
            # or pl.core_map over pltpu.create_tensorcore_mesh.
            dimension_semantics=("parallel",),
        ),
    )(x2d)

    if pad:
        return out2d.reshape(-1)[:n_elem].reshape(orig_shape)
    return out2d.reshape(orig_shape)


if __name__ == "__main__":
    key = jax.random.PRNGKey(0)
    N, C, H, W = 2, 4, 16, 16  # NCHW, matching the PyTorch conv convention
    x = jax.random.normal(key, (N, C, H, W), dtype=jnp.float32)

    fwd = jax.jit(lambda t: residual_block_forward(t, in_channels=C, out_channels=C,
                                                   activation="relu"))
    out = jax.block_until_ready(fwd(x))

    # Reference: relu(x + x)
    ref = jnp.maximum(x + x, 0.0)
    assert out.shape == x.shape
    assert out.dtype == x.dtype
    assert jnp.allclose(out, ref, atol=1e-6), "mismatch vs reference"

    print("KERNEL_OK")
</pallas_src>

<mosaic_0001>
module attributes {stable_mosaic.version = 11 : i64} {
  func.func @_residual_block_kernel(%arg0: i32, %arg1: memref<2x1024xf32, #tpu.memory_space<vmem>>, %arg2: memref<2x1024xf32, #tpu.memory_space<vmem>>) attributes {dimension_semantics = [#tpu.dimension_semantics<parallel>], iteration_bounds = array<i64: 1>, scalar_prefetch = 0 : i64, scratch_operands = 0 : i64, tpu.core_type = #tpu.core_type<tc>, window_params = [{transform_indices = @transform_0, window_bounds = array<i64: 2, 1024>}, {transform_indices = @transform_1, window_bounds = array<i64: 2, 1024>}]} {
    %c0 = arith.constant 0 : index
    %c0_0 = arith.constant 0 : index
    %0 = vector.load %arg1[%c0, %c0_0] : memref<2x1024xf32, #tpu.memory_space<vmem>>, vector<2x1024xf32>
    %1 = arith.addf %0, %0 : vector<2x1024xf32>
    %cst = arith.constant 0.000000e+00 : f32
    %2 = vector.broadcast %cst : f32 to vector<2x1024xf32>
    %3 = arith.maximumf %1, %2 : vector<2x1024xf32>
    %c0_1 = arith.constant 0 : index
    %c0_2 = arith.constant 0 : index
    %4 = vector.load %arg2[%c0_1, %c0_2] : memref<2x1024xf32, #tpu.memory_space<vmem>>, vector<2x1024xf32>
    tpu.vector_store %arg2[%c0_1, %c0_2], %3 {strides = array<i32>} : memref<2x1024xf32, #tpu.memory_space<vmem>>, vector<2x1024xf32>,
    return
  }
  func.func @transform_0(%arg0: i32) -> (i32, i32) {
    %c0_i32 = arith.constant 0 : i32
    %c0_i32_0 = arith.constant 0 : i32
    return %arg0, %c0_i32 : i32, i32
  }
  func.func @transform_1(%arg0: i32) -> (i32, i32) {
    %c0_i32 = arith.constant 0 : i32
    %c0_i32_0 = arith.constant 0 : i32
    return %arg0, %c0_i32 : i32, i32
  }
}

</mosaic_0001>

<bundles_post_ra>
// kernel: _lambda_.1
= control target key start
LH: loop header
LB: loop body
LE: loop exit
PB: predicated region body
PF: predicated region fallthrough
CT: control target
= control target key end

     0   :  { %s42_s0 = inlined_call_operand.vmem [shape: f32[2,1024], index: 0, kind: input, shape index: {}, may-alias: {0,1}]   ;;  %s43_s1 = inlined_call_operand.vmem [shape: f32[2,1024], index: 1, kind: output, shape index: {}, may-alias: {0,1}]  }
   0x1   :  { %v8_v0 = vld [vmem:[%s42_s0] sm:$0xff]  ;;  %v9_v1 = vld [vmem:[%s42_s0 + $0x8] sm:$0xff] }
   0x2   :  { %v10_v2 = vadd.f32 %v8_v0, %v8_v0  ;;  %v11_v3 = vadd.f32 %v9_v1, %v9_v1 }
   0x4   :  { %v12_v4 = vmax.f32 %v10_v2, 0.0  ;;  %v13_v5 = vmax.f32 %v11_v3, 0.0 }
   0x6   :  { %14 = vst [vmem:[%s43_s1] sm:$0xff] %v12_v4  ;;  %15 = vst [vmem:[%s43_s1 + $0x8] sm:$0xff] %v13_v5 }

</bundles_post_ra>
